<compile_context>
chip_gen: v6e
topology: v6e:2x2x1
jax: 0.10.0
libtpu: 0.0.40
codegen_flags: <defaults>
</compile_context>

<pallas_src>
import jax
import jax.numpy as jnp
from jax import lax
from jax.experimental import pallas as pl
from jax.experimental.pallas import tpu as pltpu


def _round_up(x, m):
    return ((x + m - 1) // m) * m


def _pick_th(h_low, w_full, max_rows=1024):
    """Low-res rows per grid step: largest divisor of h_low whose full-res row
    count (2*th*w_full) stays <= max_rows.  Full-res blocks are then multiples
    of 16 rows for any even w_full >= 4."""
    best = 1
    for t in range(1, h_low + 1):
        if h_low % t == 0 and 2 * t * w_full <= max_rows:
            best = t
    return best


# ----------------------------------------------------------------------------
# Fused per-stage kernel:
#   deep 1x1 conv (low res)  ->  2x bilinear upsample (f32, in VMEM)
#   + skip 1x1 conv + folded-BN shift  ->  ReLU  ->  per-pixel Linear
# ----------------------------------------------------------------------------
def _stage_kernel(x2_ref, x2p_ref, x2n_ref, x1_ref,
                  w2_ref, w1_ref, bnb_ref, wl_ref, bl_ref, o_ref):
    th, wlo, c2 = x2_ref.shape[1], x2_ref.shape[2], x2_ref.shape[3]
    cop = w2_ref.shape[1]
    w2 = w2_ref[...]

    # ---- deep branch: 1x1 conv at LOW resolution (bf16 x bf16 -> f32 on MXU) ----
    x2 = x2_ref[0].reshape(th * wlo, c2).astype(jnp.bfloat16)
    pre = jnp.dot(x2, w2, preferred_element_type=jnp.float32).reshape(th, wlo, cop)
    pre_p = jnp.dot(x2p_ref[0, 0].astype(jnp.bfloat16), w2,
                    preferred_element_type=jnp.float32)[None]          # (1, Wl, cop)
    pre_n = jnp.dot(x2n_ref[0, 0].astype(jnp.bfloat16), w2,
                    preferred_element_type=jnp.float32)[None]          # (1, Wl, cop)

    # ---- 2x bilinear upsample, align_corners=False, f32, fully in VMEM ----
    # rows: out[2j] = .25*in[j-1] + .75*in[j] ; out[2j+1] = .75*in[j] + .25*in[j+1]
    pf = jnp.concatenate([pre_p, pre, pre_n], axis=0)                  # (th+2, Wl, cop)
    even_h = 0.25 * pf[0:th] + 0.75 * pf[1:th + 1]
    odd_h = 0.75 * pf[1:th + 1] + 0.25 * pf[2:th + 2]
    up_h = jnp.stack([even_h, odd_h], axis=1).reshape(2 * th, wlo, cop)
    # cols: same weights, edge-clamped
    uf = jnp.concatenate([up_h[:, 0:1], up_h, up_h[:, wlo - 1:wlo]], axis=1)
    even_w = 0.25 * uf[:, 0:wlo] + 0.75 * uf[:, 1:wlo + 1]
    odd_w = 0.75 * uf[:, 1:wlo + 1] + 0.25 * uf[:, 2:wlo + 2]
    # interleave columns -> flattened full-res pixel order (row-major)
    pre_up = jnp.stack([even_w, odd_w], axis=2).reshape(4 * th * wlo, cop)

    # ---- skip branch + BN shift + ReLU + per-pixel Linear ----
    x1 = x1_ref[...].astype(jnp.bfloat16)                              # (4*th*Wl, c1)
    h = jnp.dot(x1, w1_ref[...], preferred_element_type=jnp.float32)
    h = h + pre_up + bnb_ref[...]
    h = jnp.maximum(h, 0.0)
    o = jnp.dot(h.astype(wl_ref.dtype), wl_ref[...],
                preferred_element_type=jnp.float32) + bl_ref[...]
    o_ref[...] = o.astype(o_ref.dtype)


def fused_stage(skip_nhwc, deep_low_nhwc, kp):
    """One decoder stage.  skip: (B, H, W, c1) full-res; deep: (B, H/2, W/2, c2)
    low-res (c2 may be the previous stage's 128-padded output width).
    Returns (B, H, W, cl_p) bf16 with the logical channels in the first kp['cl']
    columns and exact zeros in the padding columns."""
    B, Hf, Wf, c1 = skip_nhwc.shape
    Bd, Hl, Wlo, c2 = deep_low_nhwc.shape
    assert Bd == B and Hf == 2 * Hl and Wf == 2 * Wlo
    assert kp["w2"].shape[0] == c2 and kp["w1"].shape[0] == c1
    cop = kp["w1"].shape[1]
    clp = kp["wl"].shape[1]

    th = _pick_th(Hl, Wf)
    n_hb = Hl // th
    rows_blk = 2 * th * Wf                       # full-res pixels per grid step
    assert rows_blk % 8 == 0, "full-res row block must be sublane aligned"

    x1 = skip_nhwc.reshape(B * Hf * Wf, c1)      # free (contiguity-preserving)

    flops = (2 * B * Hl * Wlo * c2 * cop
             + 2 * B * n_hb * 2 * Wlo * c2 * cop         # halo rows
             + 2 * B * Hf * Wf * c1 * cop
             + 2 * B * Hf * Wf * cop * clp)
    bytes_acc = (deep_low_nhwc.size * deep_low_nhwc.dtype.itemsize
                 + x1.size * x1.dtype.itemsize
                 + B * Hf * Wf * clp * 2
                 + (kp["w2"].size + kp["w1"].size + kp["wl"].size) * 2
                 + (kp["bn_bias"].size + kp["bl"].size) * 4)

    out = pl.pallas_call(
        _stage_kernel,
        out_shape=jax.ShapeDtypeStruct((B * Hf * Wf, clp), jnp.bfloat16),
        grid=(B, n_hb),
        in_specs=[
            # low-res deep block + edge-clamped halo rows (index_map clamps)
            pl.BlockSpec((1, th, Wlo, c2), lambda b, i: (b, i, 0, 0)),
            pl.BlockSpec((1, 1, Wlo, c2),
                         lambda b, i: (b, jnp.maximum(i * th - 1, 0), 0, 0)),
            pl.BlockSpec((1, 1, Wlo, c2),
                         lambda b, i: (b, jnp.minimum((i + 1) * th, Hl - 1), 0, 0)),
            # full-res skip rows (flattened, lane/sublane dense)
            pl.BlockSpec((rows_blk, c1), lambda b, i: (b * n_hb + i, 0)),
            # weights / biases (constant block index)
            # TODO(synk): pipeline_mode=pl.Buffered(1) would halve their VMEM
            # double-buffer, but the footprint is already a few MB so it is skipped.
            pl.BlockSpec((c2, cop), lambda b, i: (0, 0)),
            pl.BlockSpec((c1, cop), lambda b, i: (0, 0)),
            pl.BlockSpec((1, cop), lambda b, i: (0, 0)),
            pl.BlockSpec((cop, clp), lambda b, i: (0, 0)),
            pl.BlockSpec((1, clp), lambda b, i: (0, 0)),
        ],
        out_specs=pl.BlockSpec((rows_blk, clp), lambda b, i: (b * n_hb + i, 0)),
        compiler_params=pltpu.CompilerParams(
            dimension_semantics=("parallel", "parallel")),
        cost_estimate=pl.CostEstimate(flops=int(flops), transcendentals=0,
                                      bytes_accessed=int(bytes_acc)),
    )(deep_low_nhwc, deep_low_nhwc, deep_low_nhwc, x1,
      kp["w2"], kp["w1"], kp["bn_bias"], kp["wl"], kp["bl"])
    return out.reshape(B, Hf, Wf, clp)


# ----------------------------------------------------------------------------
# Deterministic synthetic parameters (ConvModule: conv(no bias)+BN+ReLU; Linear)
# ----------------------------------------------------------------------------
def make_stage_params(key, c_skip, c_deep, c_out, eps=1e-5):
    ks = jax.random.split(key, 7)
    cin = c_skip + c_deep
    w_conv = jax.random.normal(ks[0], (cin, c_out), jnp.float32) / jnp.sqrt(cin)
    gamma = 1.0 + 0.1 * jax.random.normal(ks[1], (c_out,), jnp.float32)
    beta = 0.1 * jax.random.normal(ks[2], (c_out,), jnp.float32)
    r_mean = 0.1 * jax.random.normal(ks[3], (c_out,), jnp.float32)
    r_var = jnp.abs(jax.random.normal(ks[4], (c_out,), jnp.float32)) + 0.5
    scale = gamma / jnp.sqrt(r_var + eps)
    w_folded = w_conv * scale[None, :]                    # BN scale folded into conv
    bn_bias = beta - r_mean * scale                       # BN shift
    wl = jax.random.normal(ks[5], (c_out, c_out), jnp.float32) / jnp.sqrt(c_out)
    bl = 0.1 * jax.random.normal(ks[6], (c_out,), jnp.float32)
    return dict(w_folded=w_folded, bn_bias=bn_bias, wl=wl, bl=bl, c_skip=c_skip)


def prepare_kernel_params(p, deep_in_width):
    """Split the concat-conv weight into skip/deep halves, zero-pad the deep
    half's K rows to the (possibly 128-padded) width of the deep input that the
    kernel actually receives, pad all output channels to 128-lane multiples
    (zeros, so padded output columns are exact zeros), cast matmul weights to
    bf16 (biases stay f32 and are added into the f32 accumulator)."""
    c_skip = p["c_skip"]
    w = p["w_folded"]
    cout = w.shape[1]
    cl = p["wl"].shape[1]
    cout_p = _round_up(cout, 128)
    cl_p = _round_up(cl, 128)
    w1 = jnp.pad(w[:c_skip], ((0, 0), (0, cout_p - cout))).astype(jnp.bfloat16)
    w2 = w[c_skip:]
    w2 = jnp.pad(w2, ((0, deep_in_width - w2.shape[0]),
                      (0, cout_p - cout))).astype(jnp.bfloat16)
    bnb = jnp.pad(p["bn_bias"], (0, cout_p - cout))[None, :].astype(jnp.float32)
    wl = jnp.pad(p["wl"], ((0, cout_p - cout), (0, cl_p - cl))).astype(jnp.bfloat16)
    bl = jnp.pad(p["bl"], (0, cl_p - cl))[None, :].astype(jnp.float32)
    return dict(w1=w1, w2=w2, bn_bias=bnb, wl=wl, bl=bl, cl=cl)


# ----------------------------------------------------------------------------
# Decoder_1 forward (padded channels carried between stages, sliced only for
# the values returned to the caller)
# ----------------------------------------------------------------------------
def decoder_forward(encoders, kparams):
    e1, e2, e3, e4 = encoders  # NHWC pyramid, each stage 2x smaller spatially
    # decoder3 = linear_concat34(conv_concat34(Skip_Concat(encoder3, encoder4)))
    d3p = fused_stage(e3, e4, kparams["s34"])
    # decoder2 (explicit x2 upsample of decoder3 in the reference; fused here)
    d2p = fused_stage(e2, d3p, kparams["s23"])
    # decoder1
    d1p = fused_stage(e1, d2p, kparams["s12"])
    d1 = d1p[..., : kparams["s12"]["cl"]]
    d2 = d2p[..., : kparams["s23"]["cl"]]
    d3 = d3p[..., : kparams["s34"]["cl"]]
    # TODO(synk): `decoder4` is undefined in the PyTorch forward(); encoder4 is
    # passed through in its place.
    return [d1, d2, d3, e4]


# ----------------------------------------------------------------------------
# Pure-JAX f32 reference (for correctness check only)
# ----------------------------------------------------------------------------
def upsample2x_bilinear_nhwc(x):
    def interp_axis(a, axis):
        size = a.shape[axis]
        first = lax.slice_in_dim(a, 0, 1, axis=axis)
        last = lax.slice_in_dim(a, size - 1, size, axis=axis)
        prev = jnp.concatenate([first, lax.slice_in_dim(a, 0, size - 1, axis=axis)], axis=axis)
        nxt = jnp.concatenate([lax.slice_in_dim(a, 1, size, axis=axis), last], axis=axis)
        even = 0.25 * prev + 0.75 * a     # out[2i]   = 0.25*in[i-1] + 0.75*in[i]
        odd = 0.75 * a + 0.25 * nxt       # out[2i+1] = 0.75*in[i]   + 0.25*in[i+1]
        stacked = jnp.stack([even, odd], axis=axis + 1)
        new_shape = list(a.shape)
        new_shape[axis] = 2 * size
        return stacked.reshape(new_shape)
    return interp_axis(interp_axis(x, 1), 2)


def reference_stage(skip, deep_low, p):
    deep_up = upsample2x_bilinear_nhwc(deep_low.astype(jnp.float32))
    x = jnp.concatenate([skip, deep_up], axis=-1)
    h = jnp.einsum("bhwc,cd->bhwd", x, p["w_folded"]) + p["bn_bias"]
    h = jnp.maximum(h, 0.0)
    return jnp.einsum("bhwc,cd->bhwd", h, p["wl"]) + p["bl"]


if __name__ == "__main__":
    key = jax.random.PRNGKey(0)
    kk = jax.random.split(key, 8)
    embed_dims = [16, 32, 48, 64]     # small stand-ins for [64, 128, 320, 512]
    B = 2
    e1 = jax.random.normal(kk[0], (B, 16, 16, embed_dims[0]), jnp.float32)
    e2 = jax.random.normal(kk[1], (B, 8, 8, embed_dims[1]), jnp.float32)
    e3 = jax.random.normal(kk[2], (B, 4, 4, embed_dims[2]), jnp.float32)
    e4 = jax.random.normal(kk[3], (B, 2, 2, embed_dims[3]), jnp.float32)

    ref_params = {
        "s34": make_stage_params(kk[4], embed_dims[2], embed_dims[3], embed_dims[2]),
        "s23": make_stage_params(kk[5], embed_dims[1], embed_dims[2], embed_dims[1]),
        "s12": make_stage_params(kk[6], embed_dims[0], embed_dims[1], embed_dims[0]),
    }
    kp34 = prepare_kernel_params(ref_params["s34"], embed_dims[3])
    kp23 = prepare_kernel_params(ref_params["s23"], kp34["wl"].shape[1])
    kp12 = prepare_kernel_params(ref_params["s12"], kp23["wl"].shape[1])
    kparams = {"s34": kp34, "s23": kp23, "s12": kp12}

    out = decoder_forward([e1, e2, e3, e4], kparams)
    out = jax.block_until_ready(out)
    d1, d2, d3, d4 = out

    # verify each Pallas stage against the pure-JAX f32 reference on the same
    # inputs (bf16 compute -> relaxed tolerance)
    r3 = reference_stage(e3, e4, ref_params["s34"])
    r2 = reference_stage(e2, d3.astype(jnp.float32), ref_params["s23"])
    r1 = reference_stage(e1, d2.astype(jnp.float32), ref_params["s12"])
    for got, want in zip([d1, d2, d3], [r1, r2, r3]):
        assert got.shape == want.shape, (got.shape, want.shape)
        got_f32 = got.astype(jnp.float32)
        assert jnp.allclose(got_f32, want, atol=5e-2, rtol=5e-2), float(
            jnp.max(jnp.abs(got_f32 - want)))
    assert d4.shape == e4.shape

    print("KERNEL_OK")
</pallas_src>

<mosaic_0001>
module attributes {stable_mosaic.version = 11 : i64} {
  func.func @_stage_kernel(%arg0: i32, %arg1: i32, %arg2: memref<1x2x2x64xf32, #tpu.memory_space<vmem>>, %arg3: memref<1x1x2x64xf32, #tpu.memory_space<vmem>>, %arg4: memref<1x1x2x64xf32, #tpu.memory_space<vmem>>, %arg5: memref<16x48xf32, #tpu.memory_space<vmem>>, %arg6: memref<64x128xbf16, #tpu.memory_space<vmem>>, %arg7: memref<48x128xbf16, #tpu.memory_space<vmem>>, %arg8: memref<1x128xf32, #tpu.memory_space<vmem>>, %arg9: memref<128x128xbf16, #tpu.memory_space<vmem>>, %arg10: memref<1x128xf32, #tpu.memory_space<vmem>>, %arg11: memref<16x128xbf16, #tpu.memory_space<vmem>>) attributes {dimension_semantics = [#tpu.dimension_semantics<parallel>, #tpu.dimension_semantics<parallel>], iteration_bounds = array<i64: 2, 1>, scalar_prefetch = 0 : i64, scratch_operands = 0 : i64, tpu.core_type = #tpu.core_type<tc>, window_params = [{transform_indices = @transform_0, window_bounds = array<i64: 1, 2, 2, 64>}, {transform_indices = @transform_1, window_bounds = array<i64: 1, 1, 2, 64>}, {transform_indices = @transform_2, window_bounds = array<i64: 1, 1, 2, 64>}, {transform_indices = @transform_3, window_bounds = array<i64: 16, 48>}, {pipeline_mode = #tpu.pipeline_mode<synchronous>, transform_indices = @transform_4, window_bounds = array<i64: 64, 128>}, {pipeline_mode = #tpu.pipeline_mode<synchronous>, transform_indices = @transform_5, window_bounds = array<i64: 48, 128>}, {pipeline_mode = #tpu.pipeline_mode<synchronous>, transform_indices = @transform_6, window_bounds = array<i64: 1, 128>}, {pipeline_mode = #tpu.pipeline_mode<synchronous>, transform_indices = @transform_7, window_bounds = array<i64: 128, 128>}, {pipeline_mode = #tpu.pipeline_mode<synchronous>, transform_indices = @transform_8, window_bounds = array<i64: 1, 128>}, {transform_indices = @transform_9, window_bounds = array<i64: 16, 128>}]} {
    %c0 = arith.constant 0 : index
    %c0_0 = arith.constant 0 : index
    %0 = vector.load %arg6[%c0, %c0_0] : memref<64x128xbf16, #tpu.memory_space<vmem>>, vector<64x128xbf16>
    %c0_1 = arith.constant 0 : index
    %c0_2 = arith.constant 0 : index
    %c0_3 = arith.constant 0 : index
    %c0_4 = arith.constant 0 : index
    %1 = vector.load %arg2[%c0_1, %c0_2, %c0_3, %c0_4] : memref<1x2x2x64xf32, #tpu.memory_space<vmem>>, vector<1x2x2x64xf32>
    %2 = vector.shape_cast %1 : vector<1x2x2x64xf32> to vector<2x2x64xf32>
    %3 = vector.shape_cast %2 : vector<2x2x64xf32> to vector<4x64xf32>
    %4 = arith.truncf %3 : vector<4x64xf32> to vector<4x64xbf16>
    %cst = arith.constant dense<0.000000e+00> : vector<4x128xf32>
    %5 = tpu.matmul %4, %0, %cst {dimension_numbers = #tpu.dot_dimension_numbers<[1], [0], [0], [1], [0, 0, 1, 1], [], []>} : vector<4x64xbf16>, vector<64x128xbf16>, vector<4x128xf32> -> vector<4x128xf32>
    %6 = vector.shape_cast %5 : vector<4x128xf32> to vector<2x2x128xf32>
    %c0_5 = arith.constant 0 : index
    %c0_6 = arith.constant 0 : index
    %c0_7 = arith.constant 0 : index
    %c0_8 = arith.constant 0 : index
    %7 = vector.load %arg3[%c0_5, %c0_6, %c0_7, %c0_8] : memref<1x1x2x64xf32, #tpu.memory_space<vmem>>, vector<1x1x2x64xf32>
    %8 = vector.shape_cast %7 : vector<1x1x2x64xf32> to vector<2x64xf32>
    %9 = arith.truncf %8 : vector<2x64xf32> to vector<2x64xbf16>
    %cst_9 = arith.constant dense<0.000000e+00> : vector<2x128xf32>
    %10 = tpu.matmul %9, %0, %cst_9 {dimension_numbers = #tpu.dot_dimension_numbers<[1], [0], [0], [1], [0, 0, 1, 1], [], []>} : vector<2x64xbf16>, vector<64x128xbf16>, vector<2x128xf32> -> vector<2x128xf32>
    %11 = vector.shape_cast %10 : vector<2x128xf32> to vector<1x2x128xf32>
    %c0_10 = arith.constant 0 : index
    %c0_11 = arith.constant 0 : index
    %c0_12 = arith.constant 0 : index
    %c0_13 = arith.constant 0 : index
    %12 = vector.load %arg4[%c0_10, %c0_11, %c0_12, %c0_13] : memref<1x1x2x64xf32, #tpu.memory_space<vmem>>, vector<1x1x2x64xf32>
    %13 = vector.shape_cast %12 : vector<1x1x2x64xf32> to vector<2x64xf32>
    %14 = arith.truncf %13 : vector<2x64xf32> to vector<2x64xbf16>
    %cst_14 = arith.constant dense<0.000000e+00> : vector<2x128xf32>
    %15 = tpu.matmul %14, %0, %cst_14 {dimension_numbers = #tpu.dot_dimension_numbers<[1], [0], [0], [1], [0, 0, 1, 1], [], []>} : vector<2x64xbf16>, vector<64x128xbf16>, vector<2x128xf32> -> vector<2x128xf32>
    %16 = vector.shape_cast %15 : vector<2x128xf32> to vector<1x2x128xf32>
    %17 = tpu.concatenate %11, %6, %16 in 0 : vector<1x2x128xf32>, vector<2x2x128xf32>, vector<1x2x128xf32> -> vector<4x2x128xf32>
    %18 = vector.extract_strided_slice %17 {offsets = [0, 0, 0], sizes = [2, 2, 128], strides = [1, 1, 1]} : vector<4x2x128xf32> to vector<2x2x128xf32>
    %cst_15 = arith.constant 2.500000e-01 : f32
    %19 = vector.broadcast %cst_15 : f32 to vector<2x2x128xf32>
    %20 = arith.mulf %19, %18 : vector<2x2x128xf32>
    %21 = vector.extract_strided_slice %17 {offsets = [1, 0, 0], sizes = [2, 2, 128], strides = [1, 1, 1]} : vector<4x2x128xf32> to vector<2x2x128xf32>
    %cst_16 = arith.constant 7.500000e-01 : f32
    %22 = vector.broadcast %cst_16 : f32 to vector<2x2x128xf32>
    %23 = arith.mulf %22, %21 : vector<2x2x128xf32>
    %24 = arith.addf %20, %23 : vector<2x2x128xf32>
    %25 = vector.extract_strided_slice %17 {offsets = [1, 0, 0], sizes = [2, 2, 128], strides = [1, 1, 1]} : vector<4x2x128xf32> to vector<2x2x128xf32>
    %cst_17 = arith.constant 7.500000e-01 : f32
    %26 = vector.broadcast %cst_17 : f32 to vector<2x2x128xf32>
    %27 = arith.mulf %26, %25 : vector<2x2x128xf32>
    %28 = vector.extract_strided_slice %17 {offsets = [2, 0, 0], sizes = [2, 2, 128], strides = [1, 1, 1]} : vector<4x2x128xf32> to vector<2x2x128xf32>
    %cst_18 = arith.constant 2.500000e-01 : f32
    %29 = vector.broadcast %cst_18 : f32 to vector<2x2x128xf32>
    %30 = arith.mulf %29, %28 : vector<2x2x128xf32>
    %31 = arith.addf %27, %30 : vector<2x2x128xf32>
    %32 = vector.shape_cast %24 : vector<2x2x128xf32> to vector<2x1x2x128xf32>
    %33 = vector.shape_cast %31 : vector<2x2x128xf32> to vector<2x1x2x128xf32>
    %34 = tpu.concatenate %32, %33 in 1 : vector<2x1x2x128xf32>, vector<2x1x2x128xf32> -> vector<2x2x2x128xf32>
    %35 = vector.shape_cast %34 : vector<2x2x2x128xf32> to vector<4x2x128xf32>
    %36 = vector.extract_strided_slice %35 {offsets = [0, 0, 0], sizes = [4, 1, 128], strides = [1, 1, 1]} : vector<4x2x128xf32> to vector<4x1x128xf32>
    %37 = vector.extract_strided_slice %35 {offsets = [0, 1, 0], sizes = [4, 1, 128], strides = [1, 1, 1]} : vector<4x2x128xf32> to vector<4x1x128xf32>
    %38 = tpu.concatenate %36, %35, %37 in 1 : vector<4x1x128xf32>, vector<4x2x128xf32>, vector<4x1x128xf32> -> vector<4x4x128xf32>
    %39 = vector.extract_strided_slice %38 {offsets = [0, 0, 0], sizes = [4, 2, 128], strides = [1, 1, 1]} : vector<4x4x128xf32> to vector<4x2x128xf32>
    %cst_19 = arith.constant 2.500000e-01 : f32
    %40 = vector.broadcast %cst_19 : f32 to vector<4x2x128xf32>
    %41 = arith.mulf %40, %39 : vector<4x2x128xf32>
    %42 = vector.extract_strided_slice %38 {offsets = [0, 1, 0], sizes = [4, 2, 128], strides = [1, 1, 1]} : vector<4x4x128xf32> to vector<4x2x128xf32>
    %cst_20 = arith.constant 7.500000e-01 : f32
    %43 = vector.broadcast %cst_20 : f32 to vector<4x2x128xf32>
    %44 = arith.mulf %43, %42 : vector<4x2x128xf32>
    %45 = arith.addf %41, %44 : vector<4x2x128xf32>
    %46 = vector.extract_strided_slice %38 {offsets = [0, 1, 0], sizes = [4, 2, 128], strides = [1, 1, 1]} : vector<4x4x128xf32> to vector<4x2x128xf32>
    %cst_21 = arith.constant 7.500000e-01 : f32
    %47 = vector.broadcast %cst_21 : f32 to vector<4x2x128xf32>
    %48 = arith.mulf %47, %46 : vector<4x2x128xf32>
    %49 = vector.extract_strided_slice %38 {offsets = [0, 2, 0], sizes = [4, 2, 128], strides = [1, 1, 1]} : vector<4x4x128xf32> to vector<4x2x128xf32>
    %cst_22 = arith.constant 2.500000e-01 : f32
    %50 = vector.broadcast %cst_22 : f32 to vector<4x2x128xf32>
    %51 = arith.mulf %50, %49 : vector<4x2x128xf32>
    %52 = arith.addf %48, %51 : vector<4x2x128xf32>
    %53 = vector.shape_cast %45 : vector<4x2x128xf32> to vector<4x2x1x128xf32>
    %54 = vector.shape_cast %52 : vector<4x2x128xf32> to vector<4x2x1x128xf32>
    %55 = tpu.concatenate %53, %54 in 2 : vector<4x2x1x128xf32>, vector<4x2x1x128xf32> -> vector<4x2x2x128xf32>
    %56 = vector.shape_cast %55 : vector<4x2x2x128xf32> to vector<16x128xf32>
    %c0_23 = arith.constant 0 : index
    %c0_24 = arith.constant 0 : index
    %57 = vector.load %arg5[%c0_23, %c0_24] : memref<16x48xf32, #tpu.memory_space<vmem>>, vector<16x48xf32>
    %58 = arith.truncf %57 : vector<16x48xf32> to vector<16x48xbf16>
    %c0_25 = arith.constant 0 : index
    %c0_26 = arith.constant 0 : index
    %59 = vector.load %arg7[%c0_25, %c0_26] : memref<48x128xbf16, #tpu.memory_space<vmem>>, vector<48x128xbf16>
    %cst_27 = arith.constant dense<0.000000e+00> : vector<16x128xf32>
    %60 = tpu.matmul %58, %59, %cst_27 {dimension_numbers = #tpu.dot_dimension_numbers<[1], [0], [0], [1], [0, 0, 1, 1], [], []>} : vector<16x48xbf16>, vector<48x128xbf16>, vector<16x128xf32> -> vector<16x128xf32>
    %61 = arith.addf %60, %56 : vector<16x128xf32>
    %c0_28 = arith.constant 0 : index
    %c0_29 = arith.constant 0 : index
    %62 = vector.load %arg8[%c0_28, %c0_29] : memref<1x128xf32, #tpu.memory_space<vmem>>, vector<1x128xf32>
    %63 = vector.broadcast %62 : vector<1x128xf32> to vector<16x128xf32>
    %64 = arith.addf %61, %63 : vector<16x128xf32>
    %cst_30 = arith.constant 0.000000e+00 : f32
    %65 = vector.broadcast %cst_30 : f32 to vector<16x128xf32>
    %66 = arith.maximumf %64, %65 : vector<16x128xf32>
    %67 = arith.truncf %66 : vector<16x128xf32> to vector<16x128xbf16>
    %c0_31 = arith.constant 0 : index
    %c0_32 = arith.constant 0 : index
    %68 = vector.load %arg9[%c0_31, %c0_32] : memref<128x128xbf16, #tpu.memory_space<vmem>>, vector<128x128xbf16>
    %cst_33 = arith.constant dense<0.000000e+00> : vector<16x128xf32>
    %69 = tpu.matmul %67, %68, %cst_33 {dimension_numbers = #tpu.dot_dimension_numbers<[1], [0], [0], [1], [0, 0, 1, 1], [], []>} : vector<16x128xbf16>, vector<128x128xbf16>, vector<16x128xf32> -> vector<16x128xf32>
    %c0_34 = arith.constant 0 : index
    %c0_35 = arith.constant 0 : index
    %70 = vector.load %arg10[%c0_34, %c0_35] : memref<1x128xf32, #tpu.memory_space<vmem>>, vector<1x128xf32>
    %71 = vector.broadcast %70 : vector<1x128xf32> to vector<16x128xf32>
    %72 = arith.addf %69, %71 : vector<16x128xf32>
    %73 = arith.truncf %72 : vector<16x128xf32> to vector<16x128xbf16>
    %c0_36 = arith.constant 0 : index
    %c0_37 = arith.constant 0 : index
    %74 = vector.load %arg11[%c0_36, %c0_37] : memref<16x128xbf16, #tpu.memory_space<vmem>>, vector<16x128xbf16>
    tpu.vector_store %arg11[%c0_36, %c0_37], %73 {strides = array<i32>} : memref<16x128xbf16, #tpu.memory_space<vmem>>, vector<16x128xbf16>,
    return
  }
  func.func @transform_0(%arg0: i32, %arg1: i32) -> (i32, i32, i32, i32) {
    %c0_i32 = arith.constant 0 : i32
    %c0_i32_0 = arith.constant 0 : i32
    %c0_i32_1 = arith.constant 0 : i32
    return %arg0, %arg1, %c0_i32, %c0_i32_0 : i32, i32, i32, i32
  }
  func.func @transform_1(%arg0: i32, %arg1: i32) -> (i32, i32, i32, i32) {
    %c2_i32 = arith.constant 2 : i32
    %0 = arith.muli %arg1, %c2_i32 : i32
    %c1_i32 = arith.constant 1 : i32
    %1 = arith.subi %0, %c1_i32 : i32
    %c0_i32 = arith.constant 0 : i32
    %2 = arith.maxsi %1, %c0_i32 : i32
    %c0_i32_0 = arith.constant 0 : i32
    %c0_i32_1 = arith.constant 0 : i32
    %c0_i32_2 = arith.constant 0 : i32
    return %arg0, %2, %c0_i32_0, %c0_i32_1 : i32, i32, i32, i32
  }
  func.func @transform_2(%arg0: i32, %arg1: i32) -> (i32, i32, i32, i32) {
    %c1_i32 = arith.constant 1 : i32
    %0 = arith.addi %arg1, %c1_i32 : i32
    %c2_i32 = arith.constant 2 : i32
    %1 = arith.muli %0, %c2_i32 : i32
    %c1_i32_0 = arith.constant 1 : i32
    %2 = arith.minsi %1, %c1_i32_0 : i32
    %c0_i32 = arith.constant 0 : i32
    %c0_i32_1 = arith.constant 0 : i32
    %c0_i32_2 = arith.constant 0 : i32
    return %arg0, %2, %c0_i32, %c0_i32_1 : i32, i32, i32, i32
  }
  func.func @transform_3(%arg0: i32, %arg1: i32) -> (i32, i32) {
    %c1_i32 = arith.constant 1 : i32
    %0 = arith.muli %arg0, %c1_i32 : i32
    %1 = arith.addi %0, %arg1 : i32
    %c0_i32 = arith.constant 0 : i32
    %c0_i32_0 = arith.constant 0 : i32
    return %1, %c0_i32 : i32, i32
  }
  func.func @transform_4(%arg0: i32, %arg1: i32) -> (i32, i32) {
    %c0_i32 = arith.constant 0 : i32
    %c0_i32_0 = arith.constant 0 : i32
    %c0_i32_1 = arith.constant 0 : i32
    return %c0_i32, %c0_i32_0 : i32, i32
  }
  func.func @transform_5(%arg0: i32, %arg1: i32) -> (i32, i32) {
    %c0_i32 = arith.constant 0 : i32
    %c0_i32_0 = arith.constant 0 : i32
    %c0_i32_1 = arith.constant 0 : i32
    return %c0_i32, %c0_i32_0 : i32, i32
  }
  func.func @transform_6(%arg0: i32, %arg1: i32) -> (i32, i32) {
    %c0_i32 = arith.constant 0 : i32
    %c0_i32_0 = arith.constant 0 : i32
    %c0_i32_1 = arith.constant 0 : i32
    return %c0_i32, %c0_i32_0 : i32, i32
  }
  func.func @transform_7(%arg0: i32, %arg1: i32) -> (i32, i32) {
    %c0_i32 = arith.constant 0 : i32
    %c0_i32_0 = arith.constant 0 : i32
    %c0_i32_1 = arith.constant 0 : i32
    return %c0_i32, %c0_i32_0 : i32, i32
  }
  func.func @transform_8(%arg0: i32, %arg1: i32) -> (i32, i32) {
    %c0_i32 = arith.constant 0 : i32
    %c0_i32_0 = arith.constant 0 : i32
    %c0_i32_1 = arith.constant 0 : i32
    return %c0_i32, %c0_i32_0 : i32, i32
  }
  func.func @transform_9(%arg0: i32, %arg1: i32) -> (i32, i32) {
    %c1_i32 = arith.constant 1 : i32
    %0 = arith.muli %arg0, %c1_i32 : i32
    %1 = arith.addi %0, %arg1 : i32
    %c0_i32 = arith.constant 0 : i32
    %c0_i32_0 = arith.constant 0 : i32
    return %1, %c0_i32 : i32, i32
  }
}

</mosaic_0001>

<bundles_post_ra>
// kernel: tpu_custom_call.1
= control target key start
LH: loop header
LB: loop body
LE: loop exit
PB: predicated region body
PF: predicated region fallthrough
CT: control target
= control target key end

     0   :  { %s2582_s0 = inlined_call_operand.hbm [shape: f32[2,2,2,64], index: 0, kind: input, shape index: {}]   ;;  %s2583_s1 = inlined_call_operand.hbm [shape: f32[2,2,2,64], index: 1, kind: input, shape index: {}]   ;;  %s2584_s2 = inlined_call_operand.hbm [shape: f32[2,2,2,64], index: 2, kind: input, shape index: {}]   ;;  %s2585_s3 = inlined_call_operand.hbm [shape: f32[32,48], index: 3, kind: input, shape index: {}]   ;;  %s2586_s4 = inlined_call_operand.hbm [shape: bf16[64,128], index: 4, kind: input, shape index: {}]   ;;  %s2587_s5 = inlined_call_operand.hbm [shape: bf16[48,128], index: 5, kind: input, shape index: {}]   ;;  %s2588_s6 = inlined_call_operand.vmem [shape: f32[1,128], index: 6, kind: input, shape index: {}]   ;;  %s2589_s7 = inlined_call_operand.hbm [shape: bf16[128,128], index: 7, kind: input, shape index: {}]   ;;  %s2590_s8 = inlined_call_operand.vmem [shape: f32[1,128], index: 8, kind: input, shape index: {}]   ;;  %s2591_s9 = inlined_call_operand.hbm [shape: bf16[32,128], index: 9, kind: output, shape index: {}]  }
   0x1   :  { %2607 = sst [smem:[#allocation28_spill]] %s2583_s1 }
   0x2   :  { %2608 = sst [smem:[#allocation29_spill]] %s2586_s4 }
   0x3   :  { %2609 = sst [smem:[#allocation30_spill]] %s2587_s5 }
   0x4   :  { %2610 = sst [smem:[#allocation31_spill]] %s2589_s7 }
   0x5   :  { %2611 = sst [smem:[#allocation32_spill]] %s2590_s8 }
   0x6   :  { %2612 = sst [smem:[#allocation33_spill]] %s2591_s9 }
   0x7   :  { %14 = vsyncpa [#allocation3], 0 }
   0x8   :  { %16 = vsyncpa [#allocation3 + $0x1], 0 }
   0x9   :  { %17 = vsyncpa [#allocation6], 0 }
   0xa   :  { %19 = vsyncpa [#allocation6 + $0x1], 0 }
   0xb   :  { %20 = vsyncpa [#allocation9], 0 }
   0xc   :  { %22 = vsyncpa [#allocation9 + $0x1], 0 }
   0xd   :  { %23 = vsyncpa [#allocation12], 0 }
   0xe   :  { %24 = vsyncpa [#allocation4], 0 }
   0xf   :  { %26 = vsyncpa [#allocation4 + $0x1], 0  ;;  %s2193_s30 = smov 0   ;;  %s2195_s10 = smov 0  }
  0x10   :  { %s2197_s11 = smov 0   ;;  %s2199_s12 = smov 0  }
  0x11   :  { %s2201_s13 = smov 0   ;;  %s2203_s14 = smov 0  }
  0x12 LB: > { %2613 = sst [smem:[#allocation21_spill]] %s2101_s30  ;;  %s2224_s15 = sadd.s32 4294967295, %s2121_s14   ;;  %s2121_s14 = sphi %s2203_s14, %s32_s14   ;;  %s2117_s13 = sphi %s2201_s13, %s2658_s13   ;;  %s2113_s12 = sphi %s2199_s12, %s2657_s12   ;;  %s2109_s11 = sphi %s2197_s11, %s2653_s11   ;;  %s2105_s10 = sphi %s2195_s10, %s2656_s10   ;;  %s2101_s30 = sphi %s2193_s30, %s2655_s30  }
  0x13   : > { %2614 = sst [smem:[#allocation22_spill]] %s2109_s11  ;;  %s1537_s16 = sadd.s32 4294967294, %s2121_s14  }
  0x14   : > { %2615 = sst [smem:[#allocation23_spill]] %s2113_s12  ;;  %p66_p0 = scmp.ne.s32.totalorder %s2105_s10, %s2101_s30 }
  0x15   : > { %p2600_p1 = scmp.eq.s32.totalorder %s2224_s15, 0  ;;  %p297_p2 = scmp.eq.s32.totalorder %s2224_s15, 1 }
  0x16   : > { %p303_p3 = scmp.eq.s32.totalorder %s1537_s16, 1  ;;  %p1538_p5 = scmp.ge.s32.totalorder %s2121_s14, 1 }
  0x17   : > { %p2233_p4 = por %p2600_p1, %p66_p0  ;;  %p310_p7 = scmp.lt.s32.totalorder %s2121_s14, 3 }
  0x18   : > { %p2238_p6 = por %p303_p3, %p66_p0  ;;  %s2123_s20 = smov [#allocation10]  }
  0x19   : > { %p2243_p8 = pnand %p1538_p5, %p310_p7  ;;  %s322_s21 = sshll.u32 %s2123_s20, 4  ;;  %s323_s21 = int_to_ptr.vmem [resolvable:$true] %s322_s21 }
  0x1a   : > { %s2617_s18 = scalar_select %p2238_p6, 1, 0 }
  0x1b   : > { %p1722_p9 = pneg %p2243_p8  ;;  %s2124_s23 = smov [#allocation11]  }
  0x1c   : > { %2618 = sst [smem:[#allocation24_spill]] %s2617_s18  ;;  %s335_s24 = sshll.u32 %s2124_s23, 4  ;;  %s336_s24 = int_to_ptr.vmem [resolvable:$true] %s335_s24 }
  0x1d   : > { %p2252_p11 = pnand %p1722_p9, %p2600_p1  ;;  %s1846_s25 = scalar_lea.vmem %s323_s21, 512 }
  0x1e   : > { %p1847_p13 = scmp.ne.s32.totalorder %s323_s21, %s1846_s25  ;;  %p1854_p5 = scmp.lt.s32.totalorder %s323_s21, %s323_s21 }
  0x1f   : > { %p2601_p12 = pneg %p2252_p11  ;;  %p1855_p7 = scmp.lt.s32.totalorder %s1846_s25, %s1846_s25 }
  0x21   : > { %p1849_p0 = pnand %p1847_p13, %p2601_p12  ;;  %p1856_p10 = por %p1855_p7, %p1854_p5 }
  0x23   : > { %p1850_p3 = pneg %p1849_p0 }
  0x25   : > { %p1857_p9 = pnand %p1856_p10, %p1850_p3 }
  0x27   : > { %1860 = shalt.err (!%p1857_p9)
}
  0x28   : > { %s2592_s26 = smov 64   ;;  %s2593_s27 = smov 4  }
  0x29   : > { %s2621_s4 = sld [smem:[#allocation29_spill]]  ;;  %s1872_s16 = scalar_lea.vmem %s336_s24, 384 }
  0x2a   : > { %p1873_p13 = scmp.ne.s32.totalorder %s336_s24, %s1872_s16  ;;  %p1880_p10 = scmp.lt.s32.totalorder %s336_s24, %s336_s24 }
  0x2b   : > { %p1881_p3 = scmp.lt.s32.totalorder %s1872_s16, %s1872_s16 }
  0x2c   : > { %p1875_p0 = pnand %p1873_p13, %p2601_p12 }
  0x2d   : > { %p1882_p7 = por %p1881_p3, %p1880_p10 }
  0x2e   : > { %p1876_p5 = pneg %p1875_p0 }
  0x2f   : > { %1725 = dma.hbm_to_vmem [thread:$0]  (!%p2252_p11), %s2621_s4, 512, %s323_s21, [#allocation9], %s2592_s26, %s2592_s26, %s2593_s27  }
  0x30   : > { %p1883_p9 = pnand %p1882_p7, %p1876_p5 }
  0x32   : > { %1886 = shalt.err (!%p1883_p9)
}
  0x33   : > { %s2622_s5 = sld [smem:[#allocation30_spill]]  ;;  %s44_s21 = sadd.s32 1, %s2117_s13 }
  0x34   : > { %s53_s25 = sadd.s32 1, %s2109_s11  ;;  %p46_p13 = scmp.ge.s32.totalorder %s44_s21, 2 }
  0x35   : > { %p60_p0 = scmp.ne.s32.totalorder %s2109_s11, %s2105_s10  ;;  %p61_p5 = scmp.eq.s32.totalorder %s2121_s14, 0 }
  0x36   : > { %p1752_p10 = scmp.lt.s32.totalorder %s2121_s14, 2  ;;  %s2660_s21 = smov (%p46_p13, %s44_s21), 0 }
  0x37   : > { %2623 = sst [smem:[#allocation25_spill]] %s2660_s21  ;;  %p62_p3 = por %p61_p5, %p60_p0 }
  0x38   : > { %p2290_p7 = por %p297_p2, %p60_p0  ;;  %s48_s29 = ssub.s32 %s2117_s13, %s2660_s21 }
  0x39   : > { %1728 = dma.hbm_to_vmem [thread:$0]  (!%p2252_p11), %s2622_s5, 384, %s336_s24, [#allocation12], %s2592_s26, %s2592_s26, %s2593_s27  }
  0x3a   : > { %s2624_s28 = scalar_select %p2290_p7, 1, 0 }
  0x3b   : > { %s2297_s24 = sand.u32 1, %s2109_s11   ;;  %p51_p9 = scmp.eq.s32.totalorder %s48_s29, 0 }
  0x3c   : > { %2625 = sst [smem:[#allocation26_spill]] %s2624_s28  ;;  %s2300_s16 = sshll.u32 %s2117_s13, 6 }
  0x3d   : > { %p2306_p13 = pnand %p1752_p10, %p62_p3  ;;  %s2602_s5 = sand.u32 1, %s2121_s14  }
  0x3e   : > { %s2311_s4 = scalar_select %p51_p9, %s2109_s11, %s53_s25  }
  0x3f   : > { %s2603_s21 = sshll.u32 %s2297_s24, 1  ;;  %s2628_s1 = sld [smem:[#allocation28_spill]] }
  0x40   : > { %2627 = sst [smem:[#allocation27_spill]] %s2311_s4  ;;  %s395_s9 = scalar_lea.vmem [#allocation5], %s2603_s21 }
  0x41   : > { %s408_s28 = sshll.u32 %s395_s9, 4  ;;  %s2323_s20 = scalar_lea.sflag [#allocation6], %s2602_s5  ;;  %s409_s28 = int_to_ptr.vmem [resolvable:$true] %s408_s28 }
  0x42   : > { %p2604_p2 = pneg %p2306_p13  ;;  %s1900_s23 = scalar_lea.vmem %s409_s28, 32 }
  0x43   : > { %p1901_p0 = scmp.ne.s32.totalorder %s409_s28, %s1900_s23  ;;  %s2127_s25 = smov [#allocation5]  }
  0x44   : > { %s1905_s26 = sshll.u32 %s2127_s25, 4  ;;  %s1906_s26 = int_to_ptr.vmem [resolvable:$false] %s1905_s26 }
  0x45   : > { %s406_s30 = scalar_lea.hbm %s2628_s1, %s2300_s16  ;;  %p1903_p5 = pnand %p1901_p0, %p2604_p2 }
  0x46   : > { %s1907_s18 = scalar_lea.vmem %s1906_s26, 64  ;;  %p1908_p3 = scmp.lt.s32.totalorder %s409_s28, %s1906_s26 }
  0x47   : > { %p1904_p10 = pneg %p1903_p5  ;;  %p1909_p9 = scmp.lt.s32.totalorder %s1907_s18, %s1900_s23 }
  0x49   : > { %p1910_p1 = por %p1909_p9, %p1908_p3 }
  0x4b   : > { %p1911_p12 = pnand %p1910_p1, %p1904_p10 }
  0x4d   : > { %1914 = shalt.err (!%p1911_p12)
}
  0x4e   : > { %1738 = dma.hbm_to_vmem [thread:$0]  (!%p2306_p13), %s406_s30, 32, %s409_s28, %s2323_s20  }
  0x4f   : > { %s2128_s9 = smov [#allocation13]   ;;  %s1543_s5 = sshll.u32 %s2297_s24, 2 }
  0x50   : > { %s351_s29 = sshll.u32 %s2128_s9, 4  ;;  %p2629_p5 = pneg %p2252_p11  ;;  %s352_s29 = int_to_ptr.vmem [resolvable:$true] %s351_s29 }
  0x51   : > { %s1926_s21 = scalar_lea.vmem %s352_s29, 1024  ;;  %p1934_p7 = scmp.lt.s32.totalorder %s352_s29, %s352_s29 }
  0x52   : > { %p1927_p0 = scmp.ne.s32.totalorder %s352_s29, %s1926_s21  ;;  %p1935_p3 = scmp.lt.s32.totalorder %s1926_s21, %s1926_s21 }
  0x54   : > { %p1929_p2 = pnand %p1927_p0, %p2629_p5  ;;  %p1936_p1 = por %p1935_p3, %p1934_p7 }
  0x56   : > { %p1930_p6 = pneg %p1929_p2 }
  0x58   : > { %p1937_p12 = pnand %p1936_p1, %p1930_p6 }
  0x5a   : > { %1940 = shalt.err (!%p1937_p12)
}
  0x5b   : > { %s2630_s26 = smov 4   ;;  %s2631_s23 = smov 64  }
  0x5c   : > { %s2632_s7 = sld [smem:[#allocation31_spill]]  ;;  %s372_s25 = scalar_lea.vmem [#allocation2], %s1543_s5 }
  0x5d   : > { %s381_s18 = sshll.u32 %s372_s25, 4  ;;  %s369_s9 = scalar_lea.sflag [#allocation3], %s2297_s24  ;;  %s382_s18 = int_to_ptr.vmem [resolvable:$true] %s381_s18 }
  0x5e   : > { %s1954_s1 = scalar_lea.vmem %s382_s18, 64  ;;  %p2633_p6 = pneg %p2306_p13 }
  0x5f   : > { %p1955_p2 = scmp.ne.s32.totalorder %s382_s18, %s1954_s1  ;;  %s2129_s22 = smov [#allocation2]  }
  0x60   : > { %s1959_s21 = sshll.u32 %s2129_s22, 4  ;;  %s1960_s21 = int_to_ptr.vmem [resolvable:$false] %s1959_s21 }
  0x61   : > { %p1957_p7 = pnand %p1955_p2, %p2633_p6  ;;  %s1961_s4 = scalar_lea.vmem %s1960_s21, 128 }
  0x62   : > { %1731 = dma.hbm_to_vmem [thread:$0]  (!%p2252_p11), %s2632_s7, 1024, %s352_s29, [#allocation12], %s2631_s23, %s2631_s23, %s2630_s26  }
  0x63   : > { %p1958_p10 = pneg %p1957_p7  ;;  %p1962_p9 = scmp.lt.s32.totalorder %s382_s18, %s1960_s21 }
  0x64   : > { %p1963_p0 = scmp.lt.s32.totalorder %s1961_s4, %s1954_s1 }
  0x66   : > { %p1964_p5 = por %p1963_p0, %p1962_p9 }
  0x68   : > { %p1965_p3 = pnand %p1964_p5, %p1958_p10 }
  0x6a   : > { %1968 = shalt.err (!%p1965_p3)
}
  0x6b   : > { %s2130_s29 = smov 32   ;;  %s2131_s5 = smov 2  }
  0x6c   : > { %s2634_s30 = scalar_lea.hbm %s2582_s0, %s2300_s16  ;;  %s1595_s28 = sadd.s32 32, %s2300_s16 }
  0x6d   : > { %1735 = dma.hbm_to_vmem [thread:$0]  (!%p2306_p13), %s2634_s30, 64, %s382_s18, %s369_s9, %s2130_s29, %s2130_s29, %s2131_s5  }
  0x6e   : > { %s2635_s25 = sshll.u32 %s2297_s24, 1  ;;  %s430_s7 = scalar_lea.hbm %s2584_s2, %s1595_s28 }
  0x6f   : > { %s419_s22 = scalar_lea.vmem [#allocation7], %s2635_s25  ;;  %p2636_p1 = pmov %p2633_p6 }
  0x70   : > { %s432_s1 = sshll.u32 %s419_s22, 4  ;;  %s2132_s8 = smov [#allocation7]   ;;  %s433_s1 = int_to_ptr.vmem [resolvable:$true] %s432_s1 }
  0x71   : > { %s1982_s11 = scalar_lea.vmem %s433_s1, 32  ;;  %s1987_s12 = sshll.u32 %s2132_s8, 4  ;;  %s1988_s12 = int_to_ptr.vmem [resolvable:$false] %s1987_s12 }
  0x72   : > { %p1983_p11 = scmp.ne.s32.totalorder %s433_s1, %s1982_s11  ;;  %s1989_s26 = scalar_lea.vmem %s1988_s12, 64 }
  0x73   : > { %p1990_p6 = scmp.lt.s32.totalorder %s433_s1, %s1988_s12  ;;  %p1991_p7 = scmp.lt.s32.totalorder %s1989_s26, %s1982_s11 }
  0x74   : > { %p1985_p12 = pnand %p1983_p11, %p2636_p1 }
  0x75   : > { %p1992_p10 = por %p1991_p7, %p1990_p6 }
  0x76   : > { %p1986_p2 = pneg %p1985_p12 }
  0x78   : > { %p1993_p9 = pnand %p1992_p10, %p1986_p2 }
  0x7a   : > { %1996 = shalt.err (!%p1993_p9)
}
  0x7b   : > { %1741 = dma.hbm_to_vmem [thread:$0]  (!%p2306_p13), %s430_s7, 32, %s433_s1, %s2323_s20  }
  0x7c   : > { %s1552_s16 = sshll.u32 %s2297_s24, 4  ;;  %s1596_s18 = sshll.u32 %s2117_s13, 8 }
  0x7d   : > { %s450_s8 = scalar_lea.hbm %s2585_s3, %s1596_s18  ;;  %s443_s5 = scalar_lea.vmem [#allocation8], %s1552_s16 }
  0x7e   : > { %s451_s12 = sshll.u32 %s443_s5, 4  ;;  %s2637_s11 = sand.u32 1, %s2121_s14   ;;  %s452_s12 = int_to_ptr.vmem [resolvable:$true] %s451_s12 }
  0x7f   : > { %s440_s23 = scalar_lea.sflag [#allocation9], %s2637_s11  ;;  %s2010_s30 = scalar_lea.vmem %s452_s12, 256 }
  0x80   : > { %p2011_p0 = scmp.ne.s32.totalorder %s452_s12, %s2010_s30  ;;  %p2638_p5 = pmov %p2636_p1 }
  0x81   : > { %s2133_s28 = smov [#allocation8]  }
  0x82   : > { %p2013_p3 = pnand %p2011_p0, %p2638_p5  ;;  %s2015_s25 = sshll.u32 %s2133_s28, 4  ;;  %s2016_s25 = int_to_ptr.vmem [resolvable:$false] %s2015_s25 }
  0x83   : > { %s2017_s7 = scalar_lea.vmem %s2016_s25, 512  ;;  %p2018_p1 = scmp.lt.s32.totalorder %s452_s12, %s2016_s25 }
  0x84   : > { %p2014_p11 = pneg %p2013_p3  ;;  %p2019_p12 = scmp.lt.s32.totalorder %s2017_s7, %s2010_s30 }
  0x86   : > { %p2020_p2 = por %p2019_p12, %p2018_p1 }
  0x88   : > { %p2021_p6 = pnand %p2020_p2, %p2014_p11 }
  0x8a   : > { %2024 = shalt.err (!%p2021_p6)
}
  0x8b   : > { %s2134_s24 = smov 128   ;;  %s2135_s20 = smov 8  }
  0x8c   : > { %1744 = dma.hbm_to_vmem [thread:$0]  (!%p2306_p13), %s450_s8, 256, %s452_s12, %s440_s23, %s2134_s24, %s2134_s24, %s2135_s20  }
  0x8d   : > { %463 = sbr.rel (%p2243_p8) target bundleno = 654 (0x28e), region = 56  ;;  %s2383_s22 = sand.u32 (!%p2243_p8), 1, %s2105_s10  }
  0x8e   : > { %s1556_s1 = sshll.u32 (!%p2243_p8), %s2383_s22, 2  ;;  %s466_s4 = scalar_lea.sflag (!%p2243_p8), [#allocation3], %s2383_s22 }
  0x8f   : > { %s2387_s21 = scalar_lea.vmem (!%p2243_p8), [#allocation2], %s1556_s1 }
  0x92   : > { %2076 = dma.done.wait (%p2233_p4), %s466_s4, 64  }
  0x93   : > { %2078 = vsyncadd (%p2233_p4), %s466_s4, 4294967232  ;;  %s474_s19 = sand.u32 1, %s2224_s15   ;;  %s1557_s27 = sshll.u32 %s2383_s22, 1 }
  0x94   : > { %s475_s26 = scalar_lea.sflag [#allocation6], %s474_s19  ;;  %s2395_s16 = scalar_lea.vmem [#allocation5], %s1557_s27 }
  0x95   : > { %2080 = dma.done.wait (%p2233_p4), %s475_s26, 64  }
  0x96   : > { %2082 = vsyncadd (%p2233_p4), %s475_s26, 4294967232  ;;  %s1559_s18 = sshll.u32 %s2383_s22, 4  ;;  %s2402_s9 = scalar_lea.vmem [#allocation7], %s1557_s27 }
  0x97   : > { %s493_s29 = scalar_lea.sflag [#allocation9], %s474_s19  ;;  %s2404_s8 = scalar_lea.vmem [#allocation8], %s1559_s18 }
  0x98   : > { %2084 = dma.done.wait (%p2233_p4), %s493_s29, 256  }
  0x99   : > { %2086 = vsyncadd (%p2233_p4), %s493_s29, 4294967040  ;;  %p2639_p8 = scmp.eq.s32.totalorder %s2224_s15, 0 }
  0x9b   : > { %2088 = dma.done.wait (%p2639_p8), [#allocation9], 512   ;;  %p2640_p13 = pmov %p2639_p8 }
  0x9c   : > { %p2641_p7 = pmov %p2639_p8 }
  0x9d   : > { %2090 = vsyncadd (%p2640_p13), [#allocation9], 4294966784 }
  0x9e   : > { %2092 = dma.done.wait (%p2641_p7), [#allocation12], 1408   ;;  %p2642_p10 = pmov %p2641_p7 }
  0x9f   : > { %v2136_v0 = vmov 0.0   ;;  %vm2137_vm0 = vmmov 0   ;;  %v2138_v1 = vmov 1983009808   ;;  %v588_v3 = vlaneseq  ;;  %v1820_v4 = vld [vmem:[#allocation10 + $0x18] sm:$0xff]   ;;  %v1821_v7 = vld [vmem:[#allocation10 + $0x10] sm:$0xff]  }
  0xa0   : > { %2094 = vsyncadd (%p2642_p10), [#allocation12], 4294965888  ;;  %1634 = vmatprep.subr.bf16.mxu0 %v2136_v0  ;;  %1642 = vmatprep.mubr.msk.bf16.mxu0 %vm2137_vm0, %v2136_v0  ;;  %v586_v2 = vunpack.c.l.s4 %v2138_v1  ;;  %v580_v8 = vld [vmem:[%s2387_s21] sm:$0x3]  ;;  %v581_v9 = vld [vmem:[%s2387_s21 + $0x2] sm:$0x3] }
  0xa1   : > { %1670 = vmatprep.subr.bf16.mxu1 %v2136_v0  ;;  %1676 = vmatprep.mubr.msk.bf16.mxu1 %vm2137_vm0, %v2136_v0  ;;  %v2424_v6 = vshrl.u32 %v588_v3, 7  ;;  %v1822_v10 = vld [vmem:[#allocation10 + $0x8] sm:$0xff]   ;;  %v584_v11 = vcombine.low %v580_v8, %v581_v9  ;;  %v1824_v13 = vld [vmem:[#allocation11 + $0x10] sm:$0xff]   ;;  %v1823_v14 = vld [vmem:[#allocation10] sm:$0xff]   ;;  %vm618_vm1 = vcmask 523264   ;;  %vm1158_vm2 = vcmask 392192  }
  0xa2   : > { %v587_v5 = vunpack.c.0.s8 %v586_v2  ;;  %1635 = vmatpush3.bf16.msra.mxu0 %v1820_v4  ;;  %1671 = vmatpush3.bf16.msra.mxu1 %v1824_v13  ;;  %v1825_v15 = vld [vmem:[#allocation11 + $0x8] sm:$0xff]   ;;  %v1826_v17 = vld [vmem:[#allocation11] sm:$0xff]   ;;  %v673_v22 = vld [vmem:[%s2395_s16] sm:$0x3]  ;;  %vm793_vm3 = vcmask 1040384   ;;  %vm798_vm4 = vcmask 1042432  }
  0xa3   : > { %1636 = vmatprep.subr.bf16.mxu0 %v2136_v0  ;;  %1672 = vmatprep.subr.bf16.mxu1 %v2136_v0  ;;  %v1087_v18 = vld [vmem:[%s2404_s8] sm:$0xff]  ;;  %v1088_v19 = vld [vmem:[%s2404_s8 + $0x8] sm:$0xff]  ;;  %v674_v23 = vpack.c.bf16 %v673_v22, %v673_v22  ;;  %v2139_v59 = vmov 1966171168   ;;  %s2643_s5 = sld [smem:[#allocation23_spill]]  ;;  %s1563_s12 = sshll.u32 %s2383_s22, 3 }
  0xa4   : > { %v2430_v12 = vsub.s32 %v587_v5, %v2424_v6  ;;  %v1089_v21 = vpack.c.bf16 %v1088_v19, %v1087_v18  ;;  %v718_v24 = vld [vmem:[%s2402_s9] sm:$0x3]  ;;  %v1827_v26 = vld [vmem:[#allocation13 + $0x38] sm:$0xff]   ;;  %v1828_v27 = vld [vmem:[#allocation13 + $0x30] sm:$0xff]   ;;  %v848_v60 = vunpack.c.l.s4 %v2139_v59  ;;  %s2644_s30 = sld [smem:[#allocation32_spill]]  ;;  %s557_s25 = scalar_lea.vmem [#allocation14], %s1563_s12 }
  0xa5   : > { %v719_v25 = vpack.c.bf16 %v718_v24, %v718_v24  ;;  %v1829_v28 = vld [vmem:[#allocation13 + $0x28] sm:$0xff]   ;;  %v1830_v29 = vld [vmem:[#allocation13 + $0x20] sm:$0xff]   ;;  %v1831_v30 = vld [vmem:[#allocation13 + $0x18] sm:$0xff]   ;;  %s2645_s28 = sld [smem:[#allocation26_spill]]  ;;  %s1352_s7 = sshll.u32 %s557_s25, 4  ;;  %s2529_s7 = int_to_ptr.vmem [resolvable:$true] %s1352_s7 }
  0xa6   : > { %1637 = vmatpush3.bf16.msra.mxu0 %v1821_v7  ;;  %v591_v16 = vrot.slane %v584_v11, %v2430_v12  ;;  %1673 = vmatpush3.bf16.msra.mxu1 %v1825_v15  ;;  %v1832_v31 = vld [vmem:[#allocation13 + $0x10] sm:$0xff]   ;;  %v1833_v32 = vld [vmem:[#allocation13 + $0x8] sm:$0xff]   ;;  %v1834_v33 = vld [vmem:[#allocation13] sm:$0xff]   ;;  %s2646_s4 = sld [smem:[#allocation33_spill]]  ;;  %s1338_s19 = scalar_lea.sflag [#allocation4], %s2383_s22 }
  0xa7   : > { %1638 = vmatprep.subr.bf16.mxu0 %v2136_v0  ;;  %1674 = vmatprep.subr.bf16.mxu1 %v2136_v0  ;;  %s2025_s27 = scalar_lea.vmem %s2529_s7, 128  ;;  %s2140_s26 = smov [#allocation14]  }
  0xa8   : > { %v593_v20 = vpack.c.bf16 %v591_v16, %v591_v16  ;;  %p2026_p4 = scmp.ne.s32.totalorder %s2529_s7, %s2025_s27  ;;  %s2029_s16 = sshll.u32 %s2140_s26, 4  ;;  %s2030_s16 = int_to_ptr.vmem [resolvable:$false] %s2029_s16 }
  0xa9   : > { %s1599_s24 = sshll.u32 %s2643_s5, 7  ;;  %s2031_s18 = scalar_lea.vmem %s2030_s16, 256 }
  0xaa   : > { %1639 = vmatpush3.bf16.msra.mxu0 %v1822_v10  ;;  %1675 = vmatpush3.bf16.msra.mxu1 %v1826_v17  ;;  %p2032_p3 = scmp.lt.s32.totalorder %s2529_s7, %s2030_s16  ;;  %p2033_p11 = scmp.lt.s32.totalorder %s2031_s18, %s2025_s27 }
  0xab   : > { %1640 = vmatprep.subr.bf16.mxu0 %v2136_v0  ;;  %1680 = vmatprep.subr.bf16.mxu1 %v2136_v0  ;;  %p2647_p9 = scmp.ne.s32.totalorder %s2645_s28, 0 }
  0xac   : > { %s2534_s21 = scalar_lea.hbm %s2646_s4, %s1599_s24  ;;  %p2034_p1 = por %p2033_p11, %p2032_p3 }
  0xad   : > { %1677 = vmatmul.mubr.msk.bf16.vlgmr.msra.gmra.mxu1 %vm1158_vm2, %v1089_v21  ;;  %p2027_p0 = pnand %p2026_p4, %p2647_p9 }
  0xae   : > { %1641 = vmatpush3.bf16.msra.mxu0 %v1823_v14  ;;  %1696 = vmatprep.mubr.msk.bf16.mxu1 %vm2137_vm0, %v2136_v0 }
  0xaf   : > { %1646 = vmatprep.subr.bf16.mxu0 %v2136_v0  ;;  %1681 = vmatpush3.bf16.msra.mxu1 %v1827_v26  ;;  %p2028_p5 = pneg %p2027_p0 }
  0xb0   : > { %1682 = vmatprep.subr.bf16.mxu1 %v2136_v0 }
  0xb1   : > { %1643 = vmatmul.mubr.msk.bf16.vlgmr.msra.gmra.mxu0 %vm618_vm1, %v593_v20  ;;  %p2035_p12 = pnand %p2034_p1, %p2028_p5 }
  0xb2   : > { %1647 = vmatpush3.bf16.msra.mxu0 %v1820_v4  ;;  %1654 = vmatprep.mubr.msk.bf16.mxu0 %vm2137_vm0, %v2136_v0 }
  0xb3   : > { %1648 = vmatprep.subr.bf16.mxu0 %v2136_v0  ;;  %1683 = vmatpush3.bf16.msra.mxu1 %v1828_v27 }
  0xb4   : > { %1684 = vmatprep.subr.bf16.mxu1 %v2136_v0 }
  0xb6   : > { %1649 = vmatpush3.bf16.msra.mxu0 %v1821_v7 }
  0xb7   : > { %1650 = vmatprep.subr.bf16.mxu0 %v2136_v0  ;;  %1685 = vmatpush3.bf16.msra.mxu1 %v1829_v28 }
  0xb8   : > { %1686 = vmatprep.subr.bf16.mxu1 %v2136_v0 }
  0xba   : > { %1651 = vmatpush3.bf16.msra.mxu0 %v1822_v10 }
  0xbb   : > { %1652 = vmatprep.subr.bf16.mxu0 %v2136_v0  ;;  %1687 = vmatpush3.bf16.msra.mxu1 %v1830_v29 }
  0xbc   : > { %1688 = vmatprep.subr.bf16.mxu1 %v2136_v0 }
  0xbe   : > { %1653 = vmatpush3.bf16.msra.mxu0 %v1823_v14 }
  0xbf   : > { %1658 = vmatprep.subr.bf16.mxu0 %v2136_v0  ;;  %1689 = vmatpush3.bf16.msra.mxu1 %v1831_v30 }
  0xc0   : > { %1690 = vmatprep.subr.bf16.mxu1 %v2136_v0 }
  0xc1   : > { %1655 = vmatmul.mubr.msk.bf16.vlgmr.msra.gmra.mxu0 %vm618_vm1, %v674_v23 }
  0xc2   : > { %1659 = vmatpush3.bf16.msra.mxu0 %v1820_v4  ;;  %1666 = vmatprep.mubr.msk.bf16.mxu0 %vm2137_vm0, %v2136_v0  ;;  %v849_v4 = vunpack.c.0.s8 %v848_v60 }
  0xc3   : > { %1660 = vmatprep.subr.bf16.mxu0 %v2136_v0  ;;  %1691 = vmatpush3.bf16.msra.mxu1 %v1832_v31 }
  0xc4   : > { %1692 = vmatprep.subr.bf16.mxu1 %v2136_v0  ;;  %v2478_v15 = vsub.s32 %v849_v4, %v2424_v6 }
  0xc6   : > { %1661 = vmatpush3.bf16.msra.mxu0 %v1821_v7 }
  0xc7   : > { %1662 = vmatprep.subr.bf16.mxu0 %v2136_v0  ;;  %1693 = vmatpush3.bf16.msra.mxu1 %v1833_v32 }
  0xc8   : > { %1694 = vmatprep.subr.bf16.mxu1 %v2136_v0 }
  0xca   : > { %1663 = vmatpush3.bf16.msra.mxu0 %v1822_v10 }
  0xcb   : > { %1664 = vmatprep.subr.bf16.mxu0 %v2136_v0  ;;  %1695 = vmatpush3.bf16.msra.mxu1 %v1834_v33 }
  0xce   : > { %1665 = vmatpush3.bf16.msra.mxu0 %v1823_v14 }
  0xd1   : > { %1667 = vmatmul.mubr.msk.bf16.vlgmr.msra.gmra.mxu0 %vm618_vm1, %v719_v25 }
 0x16d   : > { %v2467_v37 = vpop.f32.mrf.mxu1 }
 0x16f   : > { %v1678_v41 = vpop.f32.mrf.mxu1 }
 0x171   : > { %v656_v34 = vpop.f32.mrf.mxu0  ;;  %v2469_v46 = vpop.f32.mrf.mxu1 }
 0x172   : > { %v669_v35 = vrot.slane %v656_v34, %v2430_v12 }
 0x173   : > { %v1644_v36 = vpop.f32.mrf.mxu0  ;;  %v1679_v48 = vpop.f32.mrf.mxu1 }
 0x174   : > { %v670_v38 = vcombine.high %v669_v35, %v669_v35  ;;  %v765_v39 = vmul.f32 0.75, %v669_v35  ;;  %v764_v42 = vmul.f32 0.25, %v669_v35 }
 0x175   : > { %v659_v40 = vpop.f32.mrf.mxu0 }
 0x176   : > { %v769_v43 = vmul.f32 0.25, %v670_v38  ;;  %v766_v44 = vmul.f32 0.75, %v670_v38 }
 0x177   : > { %v1645_v45 = vpop.f32.mrf.mxu0 }
 0x178   : > { %v771_v47 = vadd.f32 %v769_v43, %v765_v39  ;;  %v768_v50 = vadd.f32 %v766_v44, %v764_v42 }
 0x17a   : > { %v778_v49 = vrot.slane %v771_v47, 7  ;;  %v786_v51 = vrot.slane %v771_v47, 6  ;;  %v779_v53 = vrot.slane %v768_v50, 7  ;;  %v787_v56 = vrot.slane %v768_v50, 6 }
 0x17c   : > { %v795_v52 = vsel %vm793_vm3, %v771_v47, %v778_v49  ;;  %v796_v58 = vsel %vm793_vm3, %v768_v50, %v779_v53  ;;  %v1041_v49 = vsub.s32 0, %v2424_v6 }
 0x17d   : > { %v800_v54 = vsel %vm798_vm4, %v795_v52, %v786_v51  ;;  %v801_v1 = vsel %vm798_vm4, %v796_v58, %v787_v56 }
 0x17e   : > { %v804_v61 = vmul.f32 0.25, %v800_v54  ;;  %v808_v9 = vmul.f32 0.75, %v800_v54  ;;  %v805_v10 = vmul.f32 0.25, %v801_v1  ;;  %v809_v22 = vmul.f32 0.75, %v801_v1 }
 0x180   : > { %v832_v5 = vrot.slane %v804_v61, 1  ;;  %v816_v18 = vrot.slane %v808_v9, 1  ;;  %v833_v20 = vrot.slane %v805_v10, 1  ;;  %v817_v30 = vrot.slane %v809_v22, 1 }
 0x181   : > { %v712_v55 = vpop.f32.mrf.mxu0 }
 0x182   : > { %v763_v57 = vmul.f32 0.25, %v712_v55  ;;  %v840_v16 = vadd.f32 %v832_v5, %v808_v9  ;;  %v841_v26 = vadd.f32 %v833_v20, %v809_v22  ;;  %v824_v27 = vadd.f32 %v816_v18, %v804_v61 }
 0x183   : > { %v1656_v62 = vpop.f32.mrf.mxu0  ;;  %v825_v48 = vadd.f32 %v817_v30, %v805_v10 }
 0x184   : > { %v767_v63 = vadd.f32 %v765_v39, %v763_v57  ;;  %v976_v24 = vrot.slane %v840_v16, %v2478_v15  ;;  %v875_v39 = vrot.slane %v824_v27, %v2478_v15  ;;  %v999_v40 = vrot.slane %v841_v26, %v2478_v15 }
 0x185   : > { %v715_v0 = vpop.f32.mrf.mxu0  ;;  %v897_v62 = vrot.slane %v825_v48, %v2478_v15 }
 0x186   : > { %v777_v2 = vrot.slane %v767_v63, 7  ;;  %v785_v3 = vrot.slane %v767_v63, 6  ;;  %v977_v35 = vcombine.high %v976_v24, %v976_v24  ;;  %v984_v36 = vrot.slane %v976_v24, %v2478_v15 }
 0x187   : > { %v1657_v7 = vpop.f32.mrf.mxu0  ;;  %v876_v54 = vcombine.high %v875_v39, %v875_v39  ;;  %v1000_v55 = vcombine.high %v999_v40, %v999_v40  ;;  %v1007_v59 = vrot.slane %v999_v40, %v2478_v15  ;;  %v883_v4 = vrot.slane %v875_v39, %v2478_v15 }
 0x188   : > { %v794_v8 = vsel %vm793_vm3, %v767_v63, %v777_v2  ;;  %v991_v52 = vrot.slane %v977_v35, %v2478_v15  ;;  %v992_v53 = vcombine.high %v984_v36, %v984_v36 }
 0x189   : > { %v799_v11 = vsel %vm798_vm4, %v794_v8, %v785_v3  ;;  %v890_v5 = vrot.slane %v876_v54, %v2478_v15  ;;  %v1014_v9 = vrot.slane %v1000_v55, %v2478_v15  ;;  %v1015_v10 = vcombine.high %v1007_v59, %v1007_v59 }
 0x18a   : > { %v803_v13 = vmul.f32 0.25, %v799_v11  ;;  %v807_v14 = vmul.f32 0.75, %v799_v11  ;;  %v1050_v0 = vrot.slane %v991_v52, %v1041_v49  ;;  %v1054_v1 = vrot.slane %v992_v53, %v1041_v49 }
 0x18b   : > { %v1062_v22 = vrot.slane %v1015_v10, %v1041_v49 }
 0x18c   : > { %v815_v17 = vrot.slane %v807_v14, 1  ;;  %v831_v19 = vrot.slane %v803_v13, 1  ;;  %v1082_v16 = vsel %vm793_vm3, %v890_v5, %v1054_v1 }
 0x18e   : > { %v839_v21 = vadd.f32 %v831_v19, %v807_v14  ;;  %v823_v23 = vadd.f32 %v815_v17, %v803_v13  ;;  %v1081_v14 = vsel %vm793_vm3, %v883_v4, %v1050_v0  ;;  %v898_v17 = vcombine.high %v897_v62, %v897_v62 }
 0x190   : > { %v953_v25 = vrot.slane %v839_v21, %v2478_v15  ;;  %v853_v33 = vrot.slane %v823_v23, %v2478_v15  ;;  %v1058_v21 = vrot.slane %v1014_v9, %v1041_v49  ;;  %v1123_v23 = vcombine.low %v1081_v14, %v1082_v16 }
 0x191   : > { %v757_v28 = vpop.f32.mrf.mxu0  ;;  %v912_v26 = vrot.slane %v898_v17, %v2478_v15 }
 0x192   : > { %v770_v29 = vmul.f32 0.25, %v757_v28  ;;  %v954_v31 = vcombine.high %v953_v25, %v953_v25  ;;  %v961_v34 = vrot.slane %v953_v25, %v2478_v15  ;;  %v854_v51 = vcombine.high %v853_v33, %v853_v33 }
 0x193   : > { %v1668_v32 = vpop.f32.mrf.mxu0  ;;  %v861_v6 = vrot.slane %v853_v33, %v2478_v15  ;;  %v905_v25 = vrot.slane %v897_v62, %v2478_v15  ;;  %v1084_v33 = vsel %vm793_vm3, %v912_v26, %v1062_v22 }
 0x194   : > { %v772_v38 = vadd.f32 %v770_v29, %v766_v44  ;;  %v968_v42 = vrot.slane %v954_v31, %v2478_v15  ;;  %v969_v43 = vcombine.high %v961_v34, %v961_v34  ;;  %v868_v63 = vrot.slane %v854_v51, %v2478_v15 }
 0x195   : > { %v760_v41 = vpop.f32.mrf.mxu0  ;;  %v1083_v32 = vsel %vm793_vm3, %v905_v25, %v1058_v21  ;;  %v1137_v34 = vrot.slane %v1123_v23, %v2430_v12 }
 0x196   : > { %v780_v45 = vrot.slane %v772_v38, 7  ;;  %v788_v47 = vrot.slane %v772_v38, 6  ;;  %v1042_v57 = vrot.slane %v968_v42, %v1041_v49  ;;  %v1046_v58 = vrot.slane %v969_v43, %v1041_v49 }
 0x197   : > { %v1669_v50 = vpop.f32.mrf.mxu0  ;;  %v1139_v42 = vcombine.low %v1083_v32, %v1084_v33 }
 0x198   : > { %v797_v44 = vsel %vm793_vm3, %v772_v38, %v780_v45  ;;  %v1079_v7 = vsel %vm793_vm3, %v861_v6, %v1042_v57  ;;  %v1080_v8 = vsel %vm793_vm3, %v868_v63, %v1046_v58 }
 0x199   : > { %v802_v56 = vsel %vm798_vm4, %v797_v44, %v788_v47  ;;  %v1122_v19 = vcombine.low %v1079_v7, %v1080_v8  ;;  %v1147_v48 = vrot.slane %v1139_v42, %v2430_v12 }
 0x19a   : > { %v806_v60 = vmul.f32 0.25, %v802_v56  ;;  %v810_v61 = vmul.f32 0.75, %v802_v56 }
 0x19b   : > { %v1130_v29 = vrot.slane %v1122_v19, %v2430_v12 }
 0x19c   : > { %v818_v2 = vrot.slane %v810_v61, 1  ;;  %v834_v3 = vrot.slane %v806_v60, 1 }
 0x19d   : > { %v1138_v40 = vcombine.low %v1130_v29, %v1137_v34 }
 0x19e   : > { %v826_v11 = vadd.f32 %v818_v2, %v806_v60  ;;  %v842_v13 = vadd.f32 %v834_v3, %v810_v61 }
 0x19f   : > { %v1197_v47 = vadd.f32 %v2467_v37, %v1138_v40 }
 0x1a0   : > { %v1022_v18 = vrot.slane %v842_v13, %v2478_v15  ;;  %v919_v20 = vrot.slane %v826_v11, %v2478_v15 }
 0x1a2   : > { %v1023_v24 = vcombine.high %v1022_v18, %v1022_v18  ;;  %v920_v27 = vcombine.high %v919_v20, %v919_v20  ;;  %v1030_v28 = vrot.slane %v1022_v18, %v2478_v15  ;;  %v927_v35 = vrot.slane %v919_v20, %v2478_v15 }
 0x1a4   : > { %v1037_v30 = vrot.slane %v1023_v24, %v2478_v15  ;;  %v1038_v31 = vcombine.high %v1030_v28, %v1030_v28  ;;  %v934_v38 = vrot.slane %v920_v27, %v2478_v15  ;;  %v1575_v15 = vld [vmem:[%s2588_s6] ss:$0 sm:$0xff] }
 0x1a5   : > { %v1210_v51 = vadd.f32 %v1575_v15, %v1197_v47 }
 0x1a6   : > { %v1066_v36 = vrot.slane %v1037_v30, %v1041_v49  ;;  %v1070_v39 = vrot.slane %v1038_v31, %v1041_v49 }
 0x1a7   : > { %v1212_v44 = vmax.f32 %v1210_v51, 0.0 }
 0x1a8   : > { %v1085_v41 = vsel %vm793_vm3, %v927_v35, %v1066_v36  ;;  %v1086_v43 = vsel %vm793_vm3, %v934_v38, %v1070_v39 }
 0x1a9   : > { %v1140_v45 = vcombine.low %v1085_v41, %v1086_v43 }
 0x1ab   : > { %v1154_v50 = vrot.slane %v1140_v45, %v2430_v12  ;;  %v1576_v12 = vld [vmem:[%s2644_s30] ss:$0 sm:$0xff] }
 0x1ad   : > { %v1155_v49 = vcombine.low %v1147_v48, %v1154_v50 }
 0x1af   : > { %v1200_v52 = vadd.f32 %v2469_v46, %v1155_v49 }
 0x1b1   : > { %v1211_v53 = vadd.f32 %v1575_v15, %v1200_v52 }
 0x1b3   : > { %v1213_v54 = vmax.f32 %v1211_v53, 0.0 }
 0x1b5   : > { %v1214_v55 = vpack.c.bf16 %v1213_v54, %v1212_v44 }
 0x1b7   : > { %1697 = vmatmul.mubr.bf16.vlgmr.msra.gmra.mxu1 %v1214_v55 }
 0x277   : > { %v1320_v37 = vpop.f32.mrf.mxu1 }
 0x278   : > { %v1321_v58 = vadd.f32 %v1576_v12, %v1320_v37 }
 0x279   : > { %v1698_v56 = vpop.f32.mrf.mxu1 }
 0x27b   : > { %v1323_v57 = vpop.f32.mrf.mxu1 }
 0x27c   : > { %v1324_v46 = vadd.f32 %v1576_v12, %v1323_v57 }
 0x27d   : > { %v1699_v59 = vpop.f32.mrf.mxu1 }
 0x27e   : > { %v1603_v60 = vpack.c.bf16 %v1324_v46, %v1321_v58 }
 0x280   : > { %1604 = vst [vmem:[%s557_s25] sm:$0xff] %v1603_v60  }
 0x281   : > { %2038 = shalt.err (!%p2035_p12)
}
 0x282   : > { %s2039_s9 = scalar_lea.hbm %s2534_s21, 128  ;;  %s2043_s15 = scalar_lea.hbm %s2646_s4, 256 }
 0x283   : > { %p2040_p2 = scmp.ne.s32.totalorder %s2534_s21, %s2039_s9  ;;  %p2044_p13 = scmp.lt.s32.totalorder %s2534_s21, %s2646_s4 }
 0x284   : > { %p2045_p7 = scmp.lt.s32.totalorder %s2043_s15, %s2039_s9 }
 0x285   : > { %p2041_p6 = pnand %p2040_p2, %p2647_p9 }
 0x286   : > { %p2046_p10 = por %p2045_p7, %p2044_p13 }
 0x287   : > { %p2042_p8 = pneg %p2041_p6 }
 0x289   : > { %p2047_p4 = pnand %p2046_p10, %p2042_p8 }
 0x28b   : > { %2050 = shalt.err (!%p2047_p4)
}
 0x28c   : > { %s2141_s12 = smov 64   ;;  %s2142_s11 = smov 4  }
 0x28d   : > { %1720 = dma.vmem_to_hbm [thread:$0]  (%p2647_p9), %s2529_s7, 128, %s2534_s21, %s1338_s19, %s2141_s12, %s2141_s12, %s2142_s11  }
 0x28e PF: > { %s2648_s23 = sld [smem:[#allocation21_spill]]  ;;  %p2651_p5 = scmp.ge.s32.totalorder %s2121_s14, 2 }
 0x28f   : > { %s2649_s30 = sld [smem:[#allocation24_spill]] }
 0x294   : > { %s1367_s25 = sand.u32 1, %s2648_s23  }
 0x295   : > { %p2650_p0 = scmp.ne.s32.totalorder %s2649_s30, 0  ;;  %s1368_s24 = scalar_lea.sflag [#allocation4], %s1367_s25 }
 0x297   : > { %p1746_p3 = pnand %p2651_p5, %p2650_p0 }
 0x299   : > { %p1747_p11 = pneg %p1746_p3 }
 0x29b   : > { %2096 = dma.done.wait (%p1747_p11), %s1368_s24, 128  }
 0x29c   : > { %2098 = vsyncadd (%p1747_p11), %s1368_s24, 4294967168  ;;  %s32_s14 = sadd.s32 1, %s2121_s14   ;;  %s2652_s20 = sld [smem:[#allocation22_spill]] }
 0x29d   : > { %p29_p1 = scmp.ge.s32.totalorder %s32_s14, 4   ;;  %s2653_s11 = sld [smem:[#allocation27_spill]] }
 0x29e   : > { %s2654_s22 = sld [smem:[#allocation25_spill]]  ;;  %s2655_s30 = smov %s2105_s10 }
 0x29f   : > { %s2657_s12 = smov %s2117_s13 }
 0x2a0   :  { %31 = sbr.rel (!%p29_p1) target bundleno = 18 (0x12), region = 150 }
 0x2a2   : > { %s2656_s10 = smov %s2652_s20 }
 0x2a4   : > { %s2658_s13 = smov %s2654_s22 }
 0x2a5   :  { %1373 = vsyncpa [#allocation3], 1 }
 0x2a6   :  { %1375 = vsyncpa [#allocation3 + $0x1], 1 }
 0x2a7   :  { %1376 = vsyncpa [#allocation6], 1 }
 0x2a8   :  { %1378 = vsyncpa [#allocation6 + $0x1], 1 }
 0x2a9   :  { %1379 = vsyncpa [#allocation9], 1 }
 0x2aa   :  { %1381 = vsyncpa [#allocation9 + $0x1], 1 }
 0x2ab   :  { %1382 = vsyncpa [#allocation12], 1 }
 0x2ac   :  { %1383 = vsyncpa [#allocation4], 1 }
 0x2ad   :  { %1385 = vsyncpa [#allocation4 + $0x1], 1 }

</bundles_post_ra>
